<compile_context>
chip_gen: v7x
topology: tpu7x:2x2x1
jax: 0.10.0
libtpu: 0.0.40
codegen_flags: <defaults>
</compile_context>

<pallas_src>
import jax
import jax.numpy as jnp
from jax.experimental import pallas as pl
from jax.experimental.pallas import tpu as pltpu

_LANE_UNIT = 128                       # minimum lane-dense last-dim width
_TARGET_BLOCK_BYTES = 4 * 1024 * 1024  # ~4 MiB per buffer per grid step
_SMALL_BYTES = 256 * 1024              # below this, XLA fused relu wins
_SPLIT_BYTES = 2 * 1024 * 1024         # above this, force >=2 grid steps (v7x)


def _relu_kernel(x_ref, o_ref):
    v = x_ref[...]
    # Dtype-consistent ReLU (no implicit f32 upcast for bf16/f16 inputs).
    o_ref[...] = jnp.maximum(v, jnp.zeros((), v.dtype))


def _round_up(a: int, m: int) -> int:
    return ((a + m - 1) // m) * m


def multiple_redundant_transpose_forward(x: jax.Array) -> jax.Array:
    """Equivalent of MultipleRedundantTransposeModel.forward.

    transpose(1,2) twice and transpose(0,1) twice cancel, so the result is
    simply relu(x) with the original shape/dtype.
    """
    total = x.size
    itemsize = jnp.dtype(x.dtype).itemsize
    total_bytes = total * itemsize

    # Empty / tiny inputs: kernel launch + pipeline prologue dominates.
    # Non-128-divisible totals: a pad+slice path would add two extra full HBM
    # passes, so the XLA fused elementwise op is strictly cheaper there too.
    if total == 0 or total_bytes < _SMALL_BYTES or (total % _LANE_UNIT) != 0:
        return jnp.maximum(x, jnp.zeros((), x.dtype))

    # Lane-dense 2-D slab: last dim is the widest of {1024,512,256,128} that
    # divides the element count -> unmasked full-width `vst`, no padding.
    lane = next(l for l in (1024, 512, 256, 128) if total % l == 0)
    rows = total // lane
    x2d = x.reshape(rows, lane)

    # Native sublane packing per dtype (f32: 8, bf16/f16: 16, int8/fp8: 32).
    sub = max(8, 32 // itemsize)

    # Row tile sized in bytes (~4 MiB per buffer), rounded to sublane packing.
    row_bytes = lane * itemsize
    tile_r = max(sub, (_TARGET_BLOCK_BYTES // row_bytes) // sub * sub)

    # Ensure >= 2 grid steps for mid/large tensors so dimension_semantics
    # ("parallel",) can shard the axis across both v7x TensorCores.
    if total_bytes >= _SPLIT_BYTES:
        tile_r = min(tile_r, _round_up(pl.cdiv(rows, 2), sub))

    if tile_r >= rows:
        tile_r = rows  # single full-extent block (always a legal block shape)

    grid = (pl.cdiv(rows, tile_r),)
    block_bytes = tile_r * row_bytes
    # in + out, double-buffered (4 blocks) + headroom; explicit so v5e's
    # 16 MiB default scoped-VMEM limit never bites, capped well under v7x's
    # 64 MiB physical VMEM.
    vmem_limit = min(max(4 * block_bytes + (2 << 20), 16 << 20), 32 << 20)

    out2d = pl.pallas_call(
        _relu_kernel,
        out_shape=jax.ShapeDtypeStruct(x2d.shape, x2d.dtype),
        grid=grid,
        in_specs=[pl.BlockSpec((tile_r, lane), lambda i: (i, 0))],
        out_specs=pl.BlockSpec((tile_r, lane), lambda i: (i, 0)),
        compiler_params=pltpu.CompilerParams(
            dimension_semantics=("parallel",),
            vmem_limit_bytes=vmem_limit,
        ),
        # TODO(synk): add input_output_aliases={0: 0} when the caller can
        # donate x (saves the output HBM allocation for large activations).
    )(x2d)

    return out2d.reshape(x.shape)


if __name__ == "__main__":
    key = jax.random.PRNGKey(0)

    def ref(v):
        return jnp.maximum(v, jnp.zeros((), v.dtype))

    cases = [
        # Tiny 4-D input consistent with the module's usage -> fused XLA path.
        jax.random.normal(key, (2, 4, 16, 16), dtype=jnp.float32),
        # Medium, 128-divisible -> Pallas kernel path (f32).
        jax.random.normal(jax.random.fold_in(key, 1), (4, 8, 64, 64),
                          dtype=jnp.float32),
        # Medium, 128-divisible -> Pallas kernel path (bf16, sublane packing).
        jax.random.normal(jax.random.fold_in(key, 2), (8, 8, 64, 128),
                          dtype=jnp.float32).astype(jnp.bfloat16),
        # Medium but not 128-divisible -> fused XLA fallback (no pad/slice).
        jax.random.normal(jax.random.fold_in(key, 3), (2, 3, 130, 257),
                          dtype=jnp.float32),
    ]

    for xi in cases:
        out = jax.block_until_ready(multiple_redundant_transpose_forward(xi))
        assert out.shape == xi.shape, (out.shape, xi.shape)
        assert out.dtype == xi.dtype, (out.dtype, xi.dtype)
        assert jnp.allclose(out, ref(xi)), "mismatch vs. reference"

    print("KERNEL_OK")
</pallas_src>

<mosaic_0001>
module attributes {stable_mosaic.version = 11 : i64} {
  func.func @_relu_kernel(%arg0: i32, %arg1: memref<128x1024xf32, #tpu.memory_space<vmem>>, %arg2: memref<128x1024xf32, #tpu.memory_space<vmem>>) attributes {dimension_semantics = [#tpu.dimension_semantics<parallel>], iteration_bounds = array<i64: 1>, scalar_prefetch = 0 : i64, scratch_operands = 0 : i64, tpu.core_type = #tpu.core_type<tc>, window_params = [{transform_indices = @transform_0, window_bounds = array<i64: 128, 1024>}, {transform_indices = @transform_1, window_bounds = array<i64: 128, 1024>}]} {
    %c0 = arith.constant 0 : index
    %c0_0 = arith.constant 0 : index
    %0 = vector.load %arg1[%c0, %c0_0] : memref<128x1024xf32, #tpu.memory_space<vmem>>, vector<128x1024xf32>
    %cst = arith.constant 0.000000e+00 : f32
    %1 = vector.broadcast %cst : f32 to vector<128x1024xf32>
    %2 = arith.maximumf %0, %1 : vector<128x1024xf32>
    %c0_1 = arith.constant 0 : index
    %c0_2 = arith.constant 0 : index
    %3 = vector.load %arg2[%c0_1, %c0_2] : memref<128x1024xf32, #tpu.memory_space<vmem>>, vector<128x1024xf32>
    tpu.vector_store %arg2[%c0_1, %c0_2], %2 {strides = array<i32>} : memref<128x1024xf32, #tpu.memory_space<vmem>>, vector<128x1024xf32>,
    return
  }
  func.func @transform_0(%arg0: i32) -> (i32, i32) {
    %c0_i32 = arith.constant 0 : i32
    %c0_i32_0 = arith.constant 0 : i32
    return %arg0, %c0_i32 : i32, i32
  }
  func.func @transform_1(%arg0: i32) -> (i32, i32) {
    %c0_i32 = arith.constant 0 : i32
    %c0_i32_0 = arith.constant 0 : i32
    return %arg0, %c0_i32 : i32, i32
  }
}

</mosaic_0001>

<bundles_post_ra>
// kernel: tpu_custom_call.1
= control target key start
LH: loop header
LB: loop body
LE: loop exit
PB: predicated region body
PF: predicated region fallthrough
CT: control target
= control target key end

     0   :  { %6 = vsyncpa [#allocation3], 0  ;;  %s523_s0 = inlined_call_operand.hbm [shape: f32[128,1024], index: 0, kind: input, shape index: {}]   ;;  %s524_s1 = inlined_call_operand.hbm [shape: f32[128,1024], index: 1, kind: output, shape index: {}]  }
   0x1   :  { %7 = vsyncpa [#allocation4], 0  ;;  %s476_s6 = smov [#allocation2]   ;;  %s428_s10 = scalar_lea.hbm %s523_s0, 16384 }
   0x2   :  { %s13_s7 = sshll.u32 %s476_s6, 4  ;;  %p429_p0 = scmp.ne.s32.totalorder %s523_s0, %s428_s10  ;;  %s14_s7 = int_to_ptr.vmem [resolvable:$true] %s13_s7 }
   0x3   :  { %p432_p1 = scmp.lt.u32.totalorder %s428_s10, %s523_s0 }
   0x5   :  { %p434_p2 = pnand %p432_p1, %p429_p0 }
   0x7   :  { %437 = shalt.err (!%p434_p2)
}
   0x8   :  { %s438_s15 = scalar_lea.vmem %s14_s7, 16384  ;;  %p443_p4 = scmp.lt.s32.totalorder %s14_s7, %s14_s7 }
   0x9   :  { %p439_p3 = scmp.ne.s32.totalorder %s14_s7, %s438_s15  ;;  %p444_p5 = scmp.lt.s32.totalorder %s438_s15, %s438_s15 }
   0xb   :  { %p445_p6 = por %p444_p5, %p443_p4 }
   0xd   :  { %p446_p7 = pnand %p445_p6, %p439_p3 }
   0xf   :  { %449 = shalt.err (!%p446_p7)
}
  0x10   :  { %s477_s16 = smov 1024   ;;  %s478_s17 = smov 64  }
  0x11   :  { %19 = dma.hbm_to_vmem [thread:$0]  %s523_s0, 16384, %s14_s7, [#allocation3], %s477_s16, %s477_s16, %s478_s17  }
  0x12   :  { %472 = dma.done.wait [#allocation3], 16384  }
  0x13   :  { %473 = vsyncadd [#allocation3], 4294950912  ;;  %v23_v0 = vld [vmem:[#allocation2] sm:$0xff]  ;;  %v24_v1 = vld [vmem:[#allocation2 + $0x8] sm:$0xff]  ;;  %s479_s20 = smov [#allocation5]  }
  0x14   :  { %v25_v2 = vld [vmem:[#allocation2 + $0x10] sm:$0xff]  ;;  %s505_s21 = sshll.u32 %s479_s20, 4  ;;  %v151_v3 = vmax.f32 %v23_v0, 0.0  ;;  %v152_v4 = vmax.f32 %v24_v1, 0.0  ;;  %v26_v6 = vld [vmem:[#allocation2 + $0x18] sm:$0xff]  ;;  %v27_v7 = vld [vmem:[#allocation2 + $0x20] sm:$0xff]  ;;  %s413_s21 = int_to_ptr.vmem [resolvable:$true] %s505_s21 }
  0x15   :  { %v153_v5 = vmax.f32 %v25_v2, 0.0  ;;  %v28_v8 = vld [vmem:[#allocation2 + $0x28] sm:$0xff]  ;;  %v154_v9 = vmax.f32 %v26_v6, 0.0  ;;  %v155_v10 = vmax.f32 %v27_v7, 0.0  ;;  %v29_v12 = vld [vmem:[#allocation2 + $0x30] sm:$0xff]  ;;  %v30_v13 = vld [vmem:[#allocation2 + $0x38] sm:$0xff]  ;;  %p455_p9 = scmp.lt.s32.totalorder %s413_s21, %s413_s21 }
  0x16   :  { %v156_v11 = vmax.f32 %v28_v8, 0.0  ;;  %v31_v14 = vld [vmem:[#allocation2 + $0x40] sm:$0xff]  ;;  %279 = vst [vmem:[#allocation5] sm:$0xff] %v151_v3  ;;  %280 = vst [vmem:[#allocation5 + $0x8] sm:$0xff] %v152_v4  ;;  %v157_v15 = vmax.f32 %v29_v12, 0.0  ;;  %v158_v16 = vmax.f32 %v30_v13, 0.0 }
  0x17   :  { %281 = vst [vmem:[#allocation5 + $0x10] sm:$0xff] %v153_v5  ;;  %v159_v17 = vmax.f32 %v31_v14, 0.0  ;;  %v32_v18 = vld [vmem:[#allocation2 + $0x48] sm:$0xff]  ;;  %v33_v19 = vld [vmem:[#allocation2 + $0x50] sm:$0xff]  ;;  %v34_v20 = vld [vmem:[#allocation2 + $0x58] sm:$0xff]  ;;  %s450_s0 = scalar_lea.vmem %s413_s21, 16384 }
  0x18   :  { %282 = vst [vmem:[#allocation5 + $0x18] sm:$0xff] %v154_v9  ;;  %283 = vst [vmem:[#allocation5 + $0x20] sm:$0xff] %v155_v10  ;;  %v160_v21 = vmax.f32 %v32_v18, 0.0  ;;  %v161_v22 = vmax.f32 %v33_v19, 0.0  ;;  %v162_v23 = vmax.f32 %v34_v20, 0.0  ;;  %v35_v24 = vld [vmem:[#allocation2 + $0x60] sm:$0xff]  ;;  %p451_p8 = scmp.ne.s32.totalorder %s413_s21, %s450_s0  ;;  %p456_p10 = scmp.lt.s32.totalorder %s450_s0, %s450_s0 }
  0x19   :  { %284 = vst [vmem:[#allocation5 + $0x28] sm:$0xff] %v156_v11  ;;  %v36_v25 = vld [vmem:[#allocation2 + $0x68] sm:$0xff]  ;;  %v37_v26 = vld [vmem:[#allocation2 + $0x70] sm:$0xff]  ;;  %285 = vst [vmem:[#allocation5 + $0x30] sm:$0xff] %v157_v15  ;;  %v163_v27 = vmax.f32 %v35_v24, 0.0 }
  0x1a   :  { %286 = vst [vmem:[#allocation5 + $0x38] sm:$0xff] %v158_v16  ;;  %287 = vst [vmem:[#allocation5 + $0x40] sm:$0xff] %v159_v17  ;;  %v164_v28 = vmax.f32 %v36_v25, 0.0  ;;  %v165_v29 = vmax.f32 %v37_v26, 0.0  ;;  %v38_v30 = vld [vmem:[#allocation2 + $0x78] sm:$0xff]  ;;  %v39_v31 = vld [vmem:[#allocation2 + $0x80] sm:$0xff]  ;;  %p457_p11 = por %p456_p10, %p455_p9 }
  0x1b   :  { %v40_v32 = vld [vmem:[#allocation2 + $0x88] sm:$0xff]  ;;  %288 = vst [vmem:[#allocation5 + $0x48] sm:$0xff] %v160_v21  ;;  %289 = vst [vmem:[#allocation5 + $0x50] sm:$0xff] %v161_v22  ;;  %v166_v33 = vmax.f32 %v38_v30, 0.0  ;;  %v167_v34 = vmax.f32 %v39_v31, 0.0  ;;  %v41_v36 = vld [vmem:[#allocation2 + $0x90] sm:$0xff] }
  0x1c   :  { %290 = vst [vmem:[#allocation5 + $0x58] sm:$0xff] %v162_v23  ;;  %v168_v35 = vmax.f32 %v40_v32, 0.0  ;;  %v42_v37 = vld [vmem:[#allocation2 + $0x98] sm:$0xff]  ;;  %v43_v38 = vld [vmem:[#allocation2 + $0xa0] sm:$0xff]  ;;  %291 = vst [vmem:[#allocation5 + $0x60] sm:$0xff] %v163_v27  ;;  %v169_v39 = vmax.f32 %v41_v36, 0.0  ;;  %p458_p12 = pnand %p457_p11, %p451_p8 }
  0x1d   :  { %292 = vst [vmem:[#allocation5 + $0x68] sm:$0xff] %v164_v28  ;;  %293 = vst [vmem:[#allocation5 + $0x70] sm:$0xff] %v165_v29  ;;  %v170_v40 = vmax.f32 %v42_v37, 0.0  ;;  %v171_v41 = vmax.f32 %v43_v38, 0.0  ;;  %v44_v42 = vld [vmem:[#allocation2 + $0xa8] sm:$0xff]  ;;  %v45_v43 = vld [vmem:[#allocation2 + $0xb0] sm:$0xff] }
  0x1e   :  { %v46_v44 = vld [vmem:[#allocation2 + $0xb8] sm:$0xff]  ;;  %294 = vst [vmem:[#allocation5 + $0x78] sm:$0xff] %v166_v33  ;;  %295 = vst [vmem:[#allocation5 + $0x80] sm:$0xff] %v167_v34  ;;  %v172_v45 = vmax.f32 %v44_v42, 0.0  ;;  %v173_v46 = vmax.f32 %v45_v43, 0.0  ;;  %v47_v48 = vld [vmem:[#allocation2 + $0xc0] sm:$0xff] }
  0x1f   :  { %296 = vst [vmem:[#allocation5 + $0x88] sm:$0xff] %v168_v35  ;;  %v174_v47 = vmax.f32 %v46_v44, 0.0  ;;  %v48_v49 = vld [vmem:[#allocation2 + $0xc8] sm:$0xff]  ;;  %v49_v50 = vld [vmem:[#allocation2 + $0xd0] sm:$0xff]  ;;  %297 = vst [vmem:[#allocation5 + $0x90] sm:$0xff] %v169_v39  ;;  %v175_v51 = vmax.f32 %v47_v48, 0.0 }
  0x20   :  { %298 = vst [vmem:[#allocation5 + $0x98] sm:$0xff] %v170_v40  ;;  %299 = vst [vmem:[#allocation5 + $0xa0] sm:$0xff] %v171_v41  ;;  %v176_v52 = vmax.f32 %v48_v49, 0.0  ;;  %v177_v53 = vmax.f32 %v49_v50, 0.0  ;;  %v50_v54 = vld [vmem:[#allocation2 + $0xd8] sm:$0xff]  ;;  %v51_v55 = vld [vmem:[#allocation2 + $0xe0] sm:$0xff] }
  0x21   :  { %v52_v56 = vld [vmem:[#allocation2 + $0xe8] sm:$0xff]  ;;  %300 = vst [vmem:[#allocation5 + $0xa8] sm:$0xff] %v172_v45  ;;  %301 = vst [vmem:[#allocation5 + $0xb0] sm:$0xff] %v173_v46  ;;  %v178_v57 = vmax.f32 %v50_v54, 0.0  ;;  %v179_v58 = vmax.f32 %v51_v55, 0.0  ;;  %v53_v60 = vld [vmem:[#allocation2 + $0xf0] sm:$0xff] }
  0x22   :  { %302 = vst [vmem:[#allocation5 + $0xb8] sm:$0xff] %v174_v47  ;;  %v180_v59 = vmax.f32 %v52_v56, 0.0  ;;  %v54_v61 = vld [vmem:[#allocation2 + $0xf8] sm:$0xff]  ;;  %v55_v62 = vld [vmem:[#allocation2 + $0x100] sm:$0xff]  ;;  %303 = vst [vmem:[#allocation5 + $0xc0] sm:$0xff] %v175_v51  ;;  %v181_v63 = vmax.f32 %v53_v60, 0.0 }
  0x23   :  { %304 = vst [vmem:[#allocation5 + $0xc8] sm:$0xff] %v176_v52  ;;  %305 = vst [vmem:[#allocation5 + $0xd0] sm:$0xff] %v177_v53  ;;  %v182_v0 = vmax.f32 %v54_v61, 0.0  ;;  %v183_v1 = vmax.f32 %v55_v62, 0.0  ;;  %v56_v2 = vld [vmem:[#allocation2 + $0x108] sm:$0xff]  ;;  %v57_v3 = vld [vmem:[#allocation2 + $0x110] sm:$0xff] }
  0x24   :  { %v58_v4 = vld [vmem:[#allocation2 + $0x118] sm:$0xff]  ;;  %306 = vst [vmem:[#allocation5 + $0xd8] sm:$0xff] %v178_v57  ;;  %307 = vst [vmem:[#allocation5 + $0xe0] sm:$0xff] %v179_v58  ;;  %v184_v5 = vmax.f32 %v56_v2, 0.0  ;;  %v185_v6 = vmax.f32 %v57_v3, 0.0  ;;  %v59_v8 = vld [vmem:[#allocation2 + $0x120] sm:$0xff] }
  0x25   :  { %308 = vst [vmem:[#allocation5 + $0xe8] sm:$0xff] %v180_v59  ;;  %v186_v7 = vmax.f32 %v58_v4, 0.0  ;;  %v60_v9 = vld [vmem:[#allocation2 + $0x128] sm:$0xff]  ;;  %v61_v10 = vld [vmem:[#allocation2 + $0x130] sm:$0xff]  ;;  %309 = vst [vmem:[#allocation5 + $0xf0] sm:$0xff] %v181_v63  ;;  %v187_v11 = vmax.f32 %v59_v8, 0.0 }
  0x26   :  { %310 = vst [vmem:[#allocation5 + $0xf8] sm:$0xff] %v182_v0  ;;  %311 = vst [vmem:[#allocation5 + $0x100] sm:$0xff] %v183_v1  ;;  %v188_v12 = vmax.f32 %v60_v9, 0.0  ;;  %v189_v13 = vmax.f32 %v61_v10, 0.0  ;;  %v62_v14 = vld [vmem:[#allocation2 + $0x138] sm:$0xff]  ;;  %v63_v15 = vld [vmem:[#allocation2 + $0x140] sm:$0xff] }
  0x27   :  { %v64_v16 = vld [vmem:[#allocation2 + $0x148] sm:$0xff]  ;;  %312 = vst [vmem:[#allocation5 + $0x108] sm:$0xff] %v184_v5  ;;  %313 = vst [vmem:[#allocation5 + $0x110] sm:$0xff] %v185_v6  ;;  %v190_v17 = vmax.f32 %v62_v14, 0.0  ;;  %v191_v18 = vmax.f32 %v63_v15, 0.0  ;;  %v65_v20 = vld [vmem:[#allocation2 + $0x150] sm:$0xff] }
  0x28   :  { %314 = vst [vmem:[#allocation5 + $0x118] sm:$0xff] %v186_v7  ;;  %v192_v19 = vmax.f32 %v64_v16, 0.0  ;;  %v66_v21 = vld [vmem:[#allocation2 + $0x158] sm:$0xff]  ;;  %v67_v22 = vld [vmem:[#allocation2 + $0x160] sm:$0xff]  ;;  %315 = vst [vmem:[#allocation5 + $0x120] sm:$0xff] %v187_v11  ;;  %v193_v23 = vmax.f32 %v65_v20, 0.0 }
  0x29   :  { %316 = vst [vmem:[#allocation5 + $0x128] sm:$0xff] %v188_v12  ;;  %317 = vst [vmem:[#allocation5 + $0x130] sm:$0xff] %v189_v13  ;;  %v194_v24 = vmax.f32 %v66_v21, 0.0  ;;  %v195_v25 = vmax.f32 %v67_v22, 0.0  ;;  %v68_v26 = vld [vmem:[#allocation2 + $0x168] sm:$0xff]  ;;  %v69_v27 = vld [vmem:[#allocation2 + $0x170] sm:$0xff] }
  0x2a   :  { %v70_v28 = vld [vmem:[#allocation2 + $0x178] sm:$0xff]  ;;  %318 = vst [vmem:[#allocation5 + $0x138] sm:$0xff] %v190_v17  ;;  %319 = vst [vmem:[#allocation5 + $0x140] sm:$0xff] %v191_v18  ;;  %v196_v29 = vmax.f32 %v68_v26, 0.0  ;;  %v197_v30 = vmax.f32 %v69_v27, 0.0  ;;  %v71_v32 = vld [vmem:[#allocation2 + $0x180] sm:$0xff] }
  0x2b   :  { %320 = vst [vmem:[#allocation5 + $0x148] sm:$0xff] %v192_v19  ;;  %v198_v31 = vmax.f32 %v70_v28, 0.0  ;;  %v72_v33 = vld [vmem:[#allocation2 + $0x188] sm:$0xff]  ;;  %v73_v34 = vld [vmem:[#allocation2 + $0x190] sm:$0xff]  ;;  %321 = vst [vmem:[#allocation5 + $0x150] sm:$0xff] %v193_v23  ;;  %v199_v35 = vmax.f32 %v71_v32, 0.0 }
  0x2c   :  { %322 = vst [vmem:[#allocation5 + $0x158] sm:$0xff] %v194_v24  ;;  %323 = vst [vmem:[#allocation5 + $0x160] sm:$0xff] %v195_v25  ;;  %v200_v36 = vmax.f32 %v72_v33, 0.0  ;;  %v201_v37 = vmax.f32 %v73_v34, 0.0  ;;  %v74_v38 = vld [vmem:[#allocation2 + $0x198] sm:$0xff]  ;;  %v75_v39 = vld [vmem:[#allocation2 + $0x1a0] sm:$0xff] }
  0x2d   :  { %v76_v40 = vld [vmem:[#allocation2 + $0x1a8] sm:$0xff]  ;;  %324 = vst [vmem:[#allocation5 + $0x168] sm:$0xff] %v196_v29  ;;  %325 = vst [vmem:[#allocation5 + $0x170] sm:$0xff] %v197_v30  ;;  %v202_v41 = vmax.f32 %v74_v38, 0.0  ;;  %v203_v42 = vmax.f32 %v75_v39, 0.0  ;;  %v77_v44 = vld [vmem:[#allocation2 + $0x1b0] sm:$0xff] }
  0x2e   :  { %326 = vst [vmem:[#allocation5 + $0x178] sm:$0xff] %v198_v31  ;;  %v204_v43 = vmax.f32 %v76_v40, 0.0  ;;  %v78_v45 = vld [vmem:[#allocation2 + $0x1b8] sm:$0xff]  ;;  %v79_v46 = vld [vmem:[#allocation2 + $0x1c0] sm:$0xff]  ;;  %327 = vst [vmem:[#allocation5 + $0x180] sm:$0xff] %v199_v35  ;;  %v205_v47 = vmax.f32 %v77_v44, 0.0 }
  0x2f   :  { %328 = vst [vmem:[#allocation5 + $0x188] sm:$0xff] %v200_v36  ;;  %329 = vst [vmem:[#allocation5 + $0x190] sm:$0xff] %v201_v37  ;;  %v206_v48 = vmax.f32 %v78_v45, 0.0  ;;  %v207_v49 = vmax.f32 %v79_v46, 0.0  ;;  %v80_v50 = vld [vmem:[#allocation2 + $0x1c8] sm:$0xff]  ;;  %v81_v51 = vld [vmem:[#allocation2 + $0x1d0] sm:$0xff] }
  0x30   :  { %v82_v52 = vld [vmem:[#allocation2 + $0x1d8] sm:$0xff]  ;;  %330 = vst [vmem:[#allocation5 + $0x198] sm:$0xff] %v202_v41  ;;  %331 = vst [vmem:[#allocation5 + $0x1a0] sm:$0xff] %v203_v42  ;;  %v208_v53 = vmax.f32 %v80_v50, 0.0  ;;  %v209_v54 = vmax.f32 %v81_v51, 0.0  ;;  %v83_v56 = vld [vmem:[#allocation2 + $0x1e0] sm:$0xff] }
  0x31   :  { %332 = vst [vmem:[#allocation5 + $0x1a8] sm:$0xff] %v204_v43  ;;  %v210_v55 = vmax.f32 %v82_v52, 0.0  ;;  %v84_v57 = vld [vmem:[#allocation2 + $0x1e8] sm:$0xff]  ;;  %v85_v58 = vld [vmem:[#allocation2 + $0x1f0] sm:$0xff]  ;;  %333 = vst [vmem:[#allocation5 + $0x1b0] sm:$0xff] %v205_v47  ;;  %v211_v59 = vmax.f32 %v83_v56, 0.0 }
  0x32   :  { %334 = vst [vmem:[#allocation5 + $0x1b8] sm:$0xff] %v206_v48  ;;  %335 = vst [vmem:[#allocation5 + $0x1c0] sm:$0xff] %v207_v49  ;;  %v212_v60 = vmax.f32 %v84_v57, 0.0  ;;  %v213_v61 = vmax.f32 %v85_v58, 0.0  ;;  %v86_v62 = vld [vmem:[#allocation2 + $0x1f8] sm:$0xff]  ;;  %v87_v63 = vld [vmem:[#allocation2 + $0x200] sm:$0xff] }
  0x33   :  { %v88_v0 = vld [vmem:[#allocation2 + $0x208] sm:$0xff]  ;;  %336 = vst [vmem:[#allocation5 + $0x1c8] sm:$0xff] %v208_v53  ;;  %337 = vst [vmem:[#allocation5 + $0x1d0] sm:$0xff] %v209_v54  ;;  %v214_v1 = vmax.f32 %v86_v62, 0.0  ;;  %v215_v2 = vmax.f32 %v87_v63, 0.0  ;;  %v89_v4 = vld [vmem:[#allocation2 + $0x210] sm:$0xff] }
  0x34   :  { %338 = vst [vmem:[#allocation5 + $0x1d8] sm:$0xff] %v210_v55  ;;  %v216_v3 = vmax.f32 %v88_v0, 0.0  ;;  %v90_v5 = vld [vmem:[#allocation2 + $0x218] sm:$0xff]  ;;  %v91_v6 = vld [vmem:[#allocation2 + $0x220] sm:$0xff]  ;;  %339 = vst [vmem:[#allocation5 + $0x1e0] sm:$0xff] %v211_v59  ;;  %v217_v7 = vmax.f32 %v89_v4, 0.0 }
  0x35   :  { %340 = vst [vmem:[#allocation5 + $0x1e8] sm:$0xff] %v212_v60  ;;  %341 = vst [vmem:[#allocation5 + $0x1f0] sm:$0xff] %v213_v61  ;;  %v218_v8 = vmax.f32 %v90_v5, 0.0  ;;  %v219_v9 = vmax.f32 %v91_v6, 0.0  ;;  %v92_v10 = vld [vmem:[#allocation2 + $0x228] sm:$0xff]  ;;  %v93_v11 = vld [vmem:[#allocation2 + $0x230] sm:$0xff] }
  0x36   :  { %v94_v12 = vld [vmem:[#allocation2 + $0x238] sm:$0xff]  ;;  %342 = vst [vmem:[#allocation5 + $0x1f8] sm:$0xff] %v214_v1  ;;  %343 = vst [vmem:[#allocation5 + $0x200] sm:$0xff] %v215_v2  ;;  %v220_v13 = vmax.f32 %v92_v10, 0.0  ;;  %v221_v14 = vmax.f32 %v93_v11, 0.0  ;;  %v95_v16 = vld [vmem:[#allocation2 + $0x240] sm:$0xff] }
  0x37   :  { %344 = vst [vmem:[#allocation5 + $0x208] sm:$0xff] %v216_v3  ;;  %v222_v15 = vmax.f32 %v94_v12, 0.0  ;;  %v96_v17 = vld [vmem:[#allocation2 + $0x248] sm:$0xff]  ;;  %v97_v18 = vld [vmem:[#allocation2 + $0x250] sm:$0xff]  ;;  %345 = vst [vmem:[#allocation5 + $0x210] sm:$0xff] %v217_v7  ;;  %v223_v19 = vmax.f32 %v95_v16, 0.0 }
  0x38   :  { %346 = vst [vmem:[#allocation5 + $0x218] sm:$0xff] %v218_v8  ;;  %347 = vst [vmem:[#allocation5 + $0x220] sm:$0xff] %v219_v9  ;;  %v224_v20 = vmax.f32 %v96_v17, 0.0  ;;  %v225_v21 = vmax.f32 %v97_v18, 0.0  ;;  %v98_v22 = vld [vmem:[#allocation2 + $0x258] sm:$0xff]  ;;  %v99_v23 = vld [vmem:[#allocation2 + $0x260] sm:$0xff] }
  0x39   :  { %v100_v24 = vld [vmem:[#allocation2 + $0x268] sm:$0xff]  ;;  %348 = vst [vmem:[#allocation5 + $0x228] sm:$0xff] %v220_v13  ;;  %349 = vst [vmem:[#allocation5 + $0x230] sm:$0xff] %v221_v14  ;;  %v226_v25 = vmax.f32 %v98_v22, 0.0  ;;  %v227_v26 = vmax.f32 %v99_v23, 0.0  ;;  %v101_v28 = vld [vmem:[#allocation2 + $0x270] sm:$0xff] }
  0x3a   :  { %350 = vst [vmem:[#allocation5 + $0x238] sm:$0xff] %v222_v15  ;;  %v228_v27 = vmax.f32 %v100_v24, 0.0  ;;  %v102_v29 = vld [vmem:[#allocation2 + $0x278] sm:$0xff]  ;;  %v103_v30 = vld [vmem:[#allocation2 + $0x280] sm:$0xff]  ;;  %351 = vst [vmem:[#allocation5 + $0x240] sm:$0xff] %v223_v19  ;;  %v229_v31 = vmax.f32 %v101_v28, 0.0 }
  0x3b   :  { %352 = vst [vmem:[#allocation5 + $0x248] sm:$0xff] %v224_v20  ;;  %353 = vst [vmem:[#allocation5 + $0x250] sm:$0xff] %v225_v21  ;;  %v230_v32 = vmax.f32 %v102_v29, 0.0  ;;  %v231_v33 = vmax.f32 %v103_v30, 0.0  ;;  %v104_v34 = vld [vmem:[#allocation2 + $0x288] sm:$0xff]  ;;  %v105_v35 = vld [vmem:[#allocation2 + $0x290] sm:$0xff] }
  0x3c   :  { %v106_v36 = vld [vmem:[#allocation2 + $0x298] sm:$0xff]  ;;  %354 = vst [vmem:[#allocation5 + $0x258] sm:$0xff] %v226_v25  ;;  %355 = vst [vmem:[#allocation5 + $0x260] sm:$0xff] %v227_v26  ;;  %v232_v37 = vmax.f32 %v104_v34, 0.0  ;;  %v233_v38 = vmax.f32 %v105_v35, 0.0  ;;  %v107_v40 = vld [vmem:[#allocation2 + $0x2a0] sm:$0xff] }
  0x3d   :  { %356 = vst [vmem:[#allocation5 + $0x268] sm:$0xff] %v228_v27  ;;  %v234_v39 = vmax.f32 %v106_v36, 0.0  ;;  %v108_v41 = vld [vmem:[#allocation2 + $0x2a8] sm:$0xff]  ;;  %v109_v42 = vld [vmem:[#allocation2 + $0x2b0] sm:$0xff]  ;;  %357 = vst [vmem:[#allocation5 + $0x270] sm:$0xff] %v229_v31  ;;  %v235_v43 = vmax.f32 %v107_v40, 0.0 }
  0x3e   :  { %358 = vst [vmem:[#allocation5 + $0x278] sm:$0xff] %v230_v32  ;;  %359 = vst [vmem:[#allocation5 + $0x280] sm:$0xff] %v231_v33  ;;  %v236_v44 = vmax.f32 %v108_v41, 0.0  ;;  %v237_v45 = vmax.f32 %v109_v42, 0.0  ;;  %v110_v46 = vld [vmem:[#allocation2 + $0x2b8] sm:$0xff]  ;;  %v111_v47 = vld [vmem:[#allocation2 + $0x2c0] sm:$0xff] }
  0x3f   :  { %v112_v48 = vld [vmem:[#allocation2 + $0x2c8] sm:$0xff]  ;;  %360 = vst [vmem:[#allocation5 + $0x288] sm:$0xff] %v232_v37  ;;  %361 = vst [vmem:[#allocation5 + $0x290] sm:$0xff] %v233_v38  ;;  %v238_v49 = vmax.f32 %v110_v46, 0.0  ;;  %v239_v50 = vmax.f32 %v111_v47, 0.0  ;;  %v113_v52 = vld [vmem:[#allocation2 + $0x2d0] sm:$0xff] }
  0x40   :  { %362 = vst [vmem:[#allocation5 + $0x298] sm:$0xff] %v234_v39  ;;  %v240_v51 = vmax.f32 %v112_v48, 0.0  ;;  %v114_v53 = vld [vmem:[#allocation2 + $0x2d8] sm:$0xff]  ;;  %v115_v54 = vld [vmem:[#allocation2 + $0x2e0] sm:$0xff]  ;;  %363 = vst [vmem:[#allocation5 + $0x2a0] sm:$0xff] %v235_v43  ;;  %v241_v55 = vmax.f32 %v113_v52, 0.0 }
  0x41   :  { %364 = vst [vmem:[#allocation5 + $0x2a8] sm:$0xff] %v236_v44  ;;  %365 = vst [vmem:[#allocation5 + $0x2b0] sm:$0xff] %v237_v45  ;;  %v242_v56 = vmax.f32 %v114_v53, 0.0  ;;  %v243_v57 = vmax.f32 %v115_v54, 0.0  ;;  %v116_v58 = vld [vmem:[#allocation2 + $0x2e8] sm:$0xff]  ;;  %v117_v59 = vld [vmem:[#allocation2 + $0x2f0] sm:$0xff] }
  0x42   :  { %v118_v60 = vld [vmem:[#allocation2 + $0x2f8] sm:$0xff]  ;;  %366 = vst [vmem:[#allocation5 + $0x2b8] sm:$0xff] %v238_v49  ;;  %367 = vst [vmem:[#allocation5 + $0x2c0] sm:$0xff] %v239_v50  ;;  %v244_v61 = vmax.f32 %v116_v58, 0.0  ;;  %v245_v62 = vmax.f32 %v117_v59, 0.0  ;;  %v119_v0 = vld [vmem:[#allocation2 + $0x300] sm:$0xff] }
  0x43   :  { %368 = vst [vmem:[#allocation5 + $0x2c8] sm:$0xff] %v240_v51  ;;  %v246_v63 = vmax.f32 %v118_v60, 0.0  ;;  %v120_v1 = vld [vmem:[#allocation2 + $0x308] sm:$0xff]  ;;  %v121_v2 = vld [vmem:[#allocation2 + $0x310] sm:$0xff]  ;;  %369 = vst [vmem:[#allocation5 + $0x2d0] sm:$0xff] %v241_v55  ;;  %v247_v3 = vmax.f32 %v119_v0, 0.0 }
  0x44   :  { %370 = vst [vmem:[#allocation5 + $0x2d8] sm:$0xff] %v242_v56  ;;  %371 = vst [vmem:[#allocation5 + $0x2e0] sm:$0xff] %v243_v57  ;;  %v248_v4 = vmax.f32 %v120_v1, 0.0  ;;  %v249_v5 = vmax.f32 %v121_v2, 0.0  ;;  %v122_v6 = vld [vmem:[#allocation2 + $0x318] sm:$0xff]  ;;  %v123_v7 = vld [vmem:[#allocation2 + $0x320] sm:$0xff] }
  0x45   :  { %v124_v8 = vld [vmem:[#allocation2 + $0x328] sm:$0xff]  ;;  %372 = vst [vmem:[#allocation5 + $0x2e8] sm:$0xff] %v244_v61  ;;  %373 = vst [vmem:[#allocation5 + $0x2f0] sm:$0xff] %v245_v62  ;;  %v250_v9 = vmax.f32 %v122_v6, 0.0  ;;  %v251_v10 = vmax.f32 %v123_v7, 0.0  ;;  %v125_v12 = vld [vmem:[#allocation2 + $0x330] sm:$0xff] }
  0x46   :  { %374 = vst [vmem:[#allocation5 + $0x2f8] sm:$0xff] %v246_v63  ;;  %v252_v11 = vmax.f32 %v124_v8, 0.0  ;;  %v126_v13 = vld [vmem:[#allocation2 + $0x338] sm:$0xff]  ;;  %v127_v14 = vld [vmem:[#allocation2 + $0x340] sm:$0xff]  ;;  %375 = vst [vmem:[#allocation5 + $0x300] sm:$0xff] %v247_v3  ;;  %v253_v15 = vmax.f32 %v125_v12, 0.0 }
  0x47   :  { %376 = vst [vmem:[#allocation5 + $0x308] sm:$0xff] %v248_v4  ;;  %377 = vst [vmem:[#allocation5 + $0x310] sm:$0xff] %v249_v5  ;;  %v254_v16 = vmax.f32 %v126_v13, 0.0  ;;  %v255_v17 = vmax.f32 %v127_v14, 0.0  ;;  %v128_v18 = vld [vmem:[#allocation2 + $0x348] sm:$0xff]  ;;  %v129_v19 = vld [vmem:[#allocation2 + $0x350] sm:$0xff] }
  0x48   :  { %v130_v20 = vld [vmem:[#allocation2 + $0x358] sm:$0xff]  ;;  %378 = vst [vmem:[#allocation5 + $0x318] sm:$0xff] %v250_v9  ;;  %379 = vst [vmem:[#allocation5 + $0x320] sm:$0xff] %v251_v10  ;;  %v256_v21 = vmax.f32 %v128_v18, 0.0  ;;  %v257_v22 = vmax.f32 %v129_v19, 0.0  ;;  %v131_v24 = vld [vmem:[#allocation2 + $0x360] sm:$0xff] }
  0x49   :  { %380 = vst [vmem:[#allocation5 + $0x328] sm:$0xff] %v252_v11  ;;  %v258_v23 = vmax.f32 %v130_v20, 0.0  ;;  %v132_v25 = vld [vmem:[#allocation2 + $0x368] sm:$0xff]  ;;  %v133_v26 = vld [vmem:[#allocation2 + $0x370] sm:$0xff]  ;;  %381 = vst [vmem:[#allocation5 + $0x330] sm:$0xff] %v253_v15  ;;  %v259_v27 = vmax.f32 %v131_v24, 0.0 }
  0x4a   :  { %382 = vst [vmem:[#allocation5 + $0x338] sm:$0xff] %v254_v16  ;;  %383 = vst [vmem:[#allocation5 + $0x340] sm:$0xff] %v255_v17  ;;  %v260_v28 = vmax.f32 %v132_v25, 0.0  ;;  %v261_v29 = vmax.f32 %v133_v26, 0.0  ;;  %v134_v30 = vld [vmem:[#allocation2 + $0x378] sm:$0xff]  ;;  %v135_v31 = vld [vmem:[#allocation2 + $0x380] sm:$0xff] }
  0x4b   :  { %v136_v32 = vld [vmem:[#allocation2 + $0x388] sm:$0xff]  ;;  %384 = vst [vmem:[#allocation5 + $0x348] sm:$0xff] %v256_v21  ;;  %385 = vst [vmem:[#allocation5 + $0x350] sm:$0xff] %v257_v22  ;;  %v262_v33 = vmax.f32 %v134_v30, 0.0  ;;  %v263_v34 = vmax.f32 %v135_v31, 0.0  ;;  %v137_v36 = vld [vmem:[#allocation2 + $0x390] sm:$0xff] }
  0x4c   :  { %386 = vst [vmem:[#allocation5 + $0x358] sm:$0xff] %v258_v23  ;;  %v264_v35 = vmax.f32 %v136_v32, 0.0  ;;  %v138_v37 = vld [vmem:[#allocation2 + $0x398] sm:$0xff]  ;;  %v139_v38 = vld [vmem:[#allocation2 + $0x3a0] sm:$0xff]  ;;  %387 = vst [vmem:[#allocation5 + $0x360] sm:$0xff] %v259_v27  ;;  %v265_v39 = vmax.f32 %v137_v36, 0.0 }
  0x4d   :  { %388 = vst [vmem:[#allocation5 + $0x368] sm:$0xff] %v260_v28  ;;  %389 = vst [vmem:[#allocation5 + $0x370] sm:$0xff] %v261_v29  ;;  %v266_v40 = vmax.f32 %v138_v37, 0.0  ;;  %v267_v41 = vmax.f32 %v139_v38, 0.0  ;;  %v140_v42 = vld [vmem:[#allocation2 + $0x3a8] sm:$0xff]  ;;  %v141_v43 = vld [vmem:[#allocation2 + $0x3b0] sm:$0xff] }
  0x4e   :  { %v142_v44 = vld [vmem:[#allocation2 + $0x3b8] sm:$0xff]  ;;  %390 = vst [vmem:[#allocation5 + $0x378] sm:$0xff] %v262_v33  ;;  %391 = vst [vmem:[#allocation5 + $0x380] sm:$0xff] %v263_v34  ;;  %v268_v45 = vmax.f32 %v140_v42, 0.0  ;;  %v269_v46 = vmax.f32 %v141_v43, 0.0  ;;  %v143_v48 = vld [vmem:[#allocation2 + $0x3c0] sm:$0xff] }
  0x4f   :  { %392 = vst [vmem:[#allocation5 + $0x388] sm:$0xff] %v264_v35  ;;  %v270_v47 = vmax.f32 %v142_v44, 0.0  ;;  %v144_v49 = vld [vmem:[#allocation2 + $0x3c8] sm:$0xff]  ;;  %v145_v50 = vld [vmem:[#allocation2 + $0x3d0] sm:$0xff]  ;;  %393 = vst [vmem:[#allocation5 + $0x390] sm:$0xff] %v265_v39  ;;  %v271_v51 = vmax.f32 %v143_v48, 0.0 }
  0x50   :  { %394 = vst [vmem:[#allocation5 + $0x398] sm:$0xff] %v266_v40  ;;  %395 = vst [vmem:[#allocation5 + $0x3a0] sm:$0xff] %v267_v41  ;;  %v272_v52 = vmax.f32 %v144_v49, 0.0  ;;  %v273_v53 = vmax.f32 %v145_v50, 0.0  ;;  %v146_v54 = vld [vmem:[#allocation2 + $0x3d8] sm:$0xff]  ;;  %v147_v55 = vld [vmem:[#allocation2 + $0x3e0] sm:$0xff] }
  0x51   :  { %v148_v56 = vld [vmem:[#allocation2 + $0x3e8] sm:$0xff]  ;;  %396 = vst [vmem:[#allocation5 + $0x3a8] sm:$0xff] %v268_v45  ;;  %397 = vst [vmem:[#allocation5 + $0x3b0] sm:$0xff] %v269_v46  ;;  %v274_v57 = vmax.f32 %v146_v54, 0.0  ;;  %v275_v58 = vmax.f32 %v147_v55, 0.0  ;;  %v149_v60 = vld [vmem:[#allocation2 + $0x3f0] sm:$0xff] }
  0x52   :  { %398 = vst [vmem:[#allocation5 + $0x3b8] sm:$0xff] %v270_v47  ;;  %v276_v59 = vmax.f32 %v148_v56, 0.0  ;;  %v150_v61 = vld [vmem:[#allocation2 + $0x3f8] sm:$0xff]  ;;  %399 = vst [vmem:[#allocation5 + $0x3c0] sm:$0xff] %v271_v51  ;;  %v277_v62 = vmax.f32 %v149_v60, 0.0 }
  0x53   :  { %400 = vst [vmem:[#allocation5 + $0x3c8] sm:$0xff] %v272_v52  ;;  %401 = vst [vmem:[#allocation5 + $0x3d0] sm:$0xff] %v273_v53  ;;  %v278_v63 = vmax.f32 %v150_v61, 0.0 }
  0x54   :  { %402 = vst [vmem:[#allocation5 + $0x3d8] sm:$0xff] %v274_v57  ;;  %403 = vst [vmem:[#allocation5 + $0x3e0] sm:$0xff] %v275_v58 }
  0x55   :  { %404 = vst [vmem:[#allocation5 + $0x3e8] sm:$0xff] %v276_v59  ;;  %405 = vst [vmem:[#allocation5 + $0x3f0] sm:$0xff] %v277_v62 }
  0x56   :  { %406 = vst [vmem:[#allocation5 + $0x3f8] sm:$0xff] %v278_v63 }
  0x57   :  { %461 = shalt.err (!%p458_p12)
}
  0x58   :  { %s462_s24 = scalar_lea.hbm %s524_s1, 16384 }
  0x59   :  { %p463_p13 = scmp.ne.s32.totalorder %s524_s1, %s462_s24  ;;  %p466_p0 = scmp.lt.u32.totalorder %s462_s24, %s524_s1 }
  0x5b   :  { %p468_p1 = pnand %p466_p0, %p463_p13 }
  0x5d   :  { %471 = shalt.err (!%p468_p1)
}
  0x5e   :  { %418 = dma.vmem_to_hbm [thread:$0]  %s413_s21, 16384, %s524_s1, [#allocation4], %s477_s16, %s477_s16, %s478_s17  }
  0x5f   :  { %474 = dma.done.wait [#allocation4], 16384  }
  0x60   :  { %475 = vsyncadd [#allocation4], 4294950912 }
  0x61   :  { %422 = vsyncpa [#allocation3], 1 }
  0x62   :  { %423 = vsyncpa [#allocation4], 1 }

</bundles_post_ra>
